<compile_context>
chip_gen: v7x
topology: tpu7x:2x2x1
jax: 0.10.0
libtpu: 0.0.40
codegen_flags: <defaults>
</compile_context>

<pallas_src>
import functools
import math

import jax
import jax.numpy as jnp
from jax.experimental import pallas as pl
from jax.experimental.pallas import tpu as pltpu


# ----------------------------------------------------------------------------
# Fused Pallas kernel: projections + multi-head attention + out_proj
# ----------------------------------------------------------------------------
def fused_self_attention_kernel(src_ref, tgt_ref, bias_ref,
                                wq_ref, bq_ref, wkv_ref, bkv_ref,
                                wo_ref, bo_ref,
                                o_ref,
                                kv_ref,
                                *, num_heads, head_size):
    d = num_heads * head_size

    # --- K/V projection hoisted out of the query-tile loop -------------------
    # Computed once per batch element (q-tile 0) into VMEM scratch, reused for
    # all subsequent query tiles of the same batch (q grid axis is "arbitrary").
    @pl.when(pl.program_id(1) == 0)
    def _():
        kv_ref[...] = (
            jnp.dot(tgt_ref[0], wkv_ref[...], preferred_element_type=jnp.float32)
            + bkv_ref[...])

    x_src = src_ref[0]                       # (tq, D)
    bias = bias_ref[0]                       # (1, Lk) additive key-padding bias

    # Q projection.  1/sqrt(head_size) is already folded into wq/bq.
    q = jnp.dot(x_src, wq_ref[...], preferred_element_type=jnp.float32) + bq_ref[...]

    kv = kv_ref[...]                         # (Lk, 2D)
    k = kv[:, :d]
    v = kv[:, d:]

    tq = q.shape[0]
    lk = k.shape[0]

    # Head split: one reshape + one major-dim transpose (no per-head extracts).
    # NOTE: head_size < 128 under-fills the MXU contraction depth; at production
    # shapes target head_size/D as multiples of 128.
    qh = q.reshape(tq, num_heads, head_size).transpose(1, 0, 2)   # (H, tq, hs)
    kh = k.reshape(lk, num_heads, head_size).transpose(1, 0, 2)   # (H, Lk, hs)
    vh = v.reshape(lk, num_heads, head_size).transpose(1, 0, 2)   # (H, Lk, hs)

    # Head-batched attention scores (scale folded into Q).
    s = jnp.einsum("hqd,hkd->hqk", qh, kh, preferred_element_type=jnp.float32)
    s = s + bias[None]                        # (H, tq, Lk)

    # softmax in f32; EUP approx reciprocal + one Newton-Raphson refinement.
    m = jnp.max(s, axis=-1, keepdims=True)
    p = jnp.exp(s - m)
    denom = jnp.sum(p, axis=-1, keepdims=True)
    r = pl.reciprocal(denom, approx=True)
    r = r * (2.0 - denom * r)                 # NR step -> ~f32-exact
    p = p * r

    o = jnp.einsum("hqk,hkd->hqd", p, vh, preferred_element_type=jnp.float32)

    # Merge heads back to (tq, D), then ONE full-depth out_proj matmul.
    o_merged = o.transpose(1, 0, 2).reshape(tq, d)
    o_ref[0] = (jnp.dot(o_merged, wo_ref[...], preferred_element_type=jnp.float32)
                + bo_ref[...])


# ----------------------------------------------------------------------------
# Parameter folding (done ONCE, outside the forward path)
# ----------------------------------------------------------------------------
def fold_params(params, num_heads):
    D = params["wq"].shape[0]
    scale = 1.0 / math.sqrt(D // num_heads)

    # (outer Linear o in_proj) -> one effective linear per stream:
    #   y = x @ (w_in @ w)^T + (w_in @ b + b_in)
    # The 1/sqrt(head_size) attention scale is folded into the Q stream.
    wq_eff = (params["w_in_q"] @ params["wq"]) * scale
    bq_eff = (params["w_in_q"] @ params["bq"] + params["b_in_q"]) * scale
    wk_eff = params["w_in_k"] @ params["wk"]
    bk_eff = params["w_in_k"] @ params["bk"] + params["b_in_k"]
    wv_eff = params["w_in_v"] @ params["wv"]
    bv_eff = params["w_in_v"] @ params["bv"] + params["b_in_v"]

    return {
        "wq_t": jnp.asarray(wq_eff.T, jnp.float32),                       # (D, D)
        "bq": jnp.asarray(bq_eff, jnp.float32).reshape(1, D),
        # K and V concatenated -> one lane-dense (D, 2D) projection weight.
        "wkv_t": jnp.concatenate([wk_eff.T, wv_eff.T], axis=1).astype(jnp.float32),
        "bkv": jnp.concatenate([bk_eff, bv_eff]).astype(jnp.float32).reshape(1, 2 * D),
        # out_proj pre-transposed; applied as one (tq,D)@(D,D) matmul.
        "wo_t": jnp.asarray(params["w_out"].T, jnp.float32),              # (D, D)
        "bo": jnp.asarray(params["b_out"], jnp.float32).reshape(1, D),
    }


# ----------------------------------------------------------------------------
# VMEM budget (blocks + scratch + intermediate headroom)
# ----------------------------------------------------------------------------
def _vmem_limit_bytes(tq, Lk, D, num_heads):
    f32 = 4
    blocks = (2 * tq * D              # src (double-buffered)
              + 2 * Lk * D            # tgt (double-buffered)
              + 2 * Lk                # key-pad bias
              + (D * D + D)           # wq_t + bq   (single-buffered)
              + (2 * D * D + 2 * D)   # wkv_t + bkv (single-buffered)
              + (D * D + D)           # wo_t + bo   (single-buffered)
              + 2 * tq * D            # output (double-buffered)
              + Lk * 2 * D)           # kv scratch
    interm = (4 * num_heads * tq * Lk         # scores / exp / probs
              + 6 * tq * D + 4 * Lk * D)      # head splits, merged output
    budget = int(1.5 * f32 * (blocks + interm)) + (1 << 20)
    return max(32 * 1024 * 1024, min(budget, 128 * 1024 * 1024))


# ----------------------------------------------------------------------------
# SelfAttentionBlock forward (single pallas_call)
# ----------------------------------------------------------------------------
def self_attention_block_forward(folded, src, tgt, mask, num_heads):
    B, Lq, D = src.shape
    Lk = tgt.shape[1]
    head_size = D // num_heads

    # Query-row tiling: whole sequence when small; otherwise large tiles for
    # v5e/v6e (128 MiB VMEM).  TODO(synk): cap tq at 128 and stream Lk
    # flash-style for v7x's 64 MiB VMEM at long sequence lengths.
    if Lq <= 512:
        tq = Lq
    else:
        tq = next((t for t in (512, 256, 128) if Lq % t == 0), None)
        assert tq is not None, "TODO(synk): pad Lq to a multiple of 128"
    nq = Lq // tq

    # key_padding_mask in the module is (~mask).squeeze(-1), True == pad.
    # Large finite negative (not -inf) keeps softmax NaN-free.
    valid = mask.astype(bool).reshape(B, 1, Lk)
    key_pad_bias = jnp.where(valid, 0.0, -1e30).astype(jnp.float32)

    kern = functools.partial(fused_self_attention_kernel,
                             num_heads=num_heads, head_size=head_size)

    # Grid-invariant operands are single-buffered (default double-buffering
    # wastes a full extra copy of every weight in VMEM).
    const = pl.Buffered(1)

    return pl.pallas_call(
        kern,
        out_shape=jax.ShapeDtypeStruct((B, Lq, D), jnp.float32),
        grid=(B, nq),
        in_specs=[
            pl.BlockSpec((1, tq, D), lambda b, q: (b, q, 0)),                   # src
            pl.BlockSpec((1, Lk, D), lambda b, q: (b, 0, 0)),                   # tgt
            pl.BlockSpec((1, 1, Lk), lambda b, q: (b, 0, 0)),                   # key-pad bias
            pl.BlockSpec((D, D), lambda b, q: (0, 0), pipeline_mode=const),     # wq_t
            pl.BlockSpec((1, D), lambda b, q: (0, 0), pipeline_mode=const),     # bq
            pl.BlockSpec((D, 2 * D), lambda b, q: (0, 0), pipeline_mode=const), # wkv_t
            pl.BlockSpec((1, 2 * D), lambda b, q: (0, 0), pipeline_mode=const), # bkv
            pl.BlockSpec((D, D), lambda b, q: (0, 0), pipeline_mode=const),     # wo_t
            pl.BlockSpec((1, D), lambda b, q: (0, 0), pipeline_mode=const),     # bo
        ],
        out_specs=pl.BlockSpec((1, tq, D), lambda b, q: (b, q, 0)),
        scratch_shapes=[pltpu.VMEM((Lk, 2 * D), jnp.float32)],                  # hoisted K|V
        compiler_params=pltpu.CompilerParams(
            dimension_semantics=("parallel", "arbitrary"),
            vmem_limit_bytes=_vmem_limit_bytes(tq, Lk, D, num_heads)),
    )(src, tgt, key_pad_bias,
      folded["wq_t"], folded["bq"], folded["wkv_t"], folded["bkv"],
      folded["wo_t"], folded["bo"])


# ----------------------------------------------------------------------------
# Pure-JAX reference (mirrors the PyTorch module, unfused weights)
# ----------------------------------------------------------------------------
def reference_forward(params, src, tgt, mask, num_heads):
    B, Lq, D = src.shape
    Lk = tgt.shape[1]
    hs = D // num_heads

    def lin(x, w, b):
        return x @ w.T + b

    q1 = lin(src, params["wq"], params["bq"])
    k1 = lin(tgt, params["wk"], params["bk"])
    v1 = lin(tgt, params["wv"], params["bv"])
    Q = lin(q1, params["w_in_q"], params["b_in_q"])
    K = lin(k1, params["w_in_k"], params["b_in_k"])
    V = lin(v1, params["w_in_v"], params["b_in_v"])

    Qh = Q.reshape(B, Lq, num_heads, hs).transpose(0, 2, 1, 3)
    Kh = K.reshape(B, Lk, num_heads, hs).transpose(0, 2, 1, 3)
    Vh = V.reshape(B, Lk, num_heads, hs).transpose(0, 2, 1, 3)

    s = jnp.einsum("bhqd,bhkd->bhqk", Qh, Kh) / math.sqrt(hs)
    valid = mask.astype(bool).reshape(B, 1, 1, Lk)
    s = jnp.where(valid, s, -jnp.inf)
    p = jax.nn.softmax(s, axis=-1)
    o = jnp.einsum("bhqk,bhkd->bhqd", p, Vh)
    o = o.transpose(0, 2, 1, 3).reshape(B, Lq, D)
    return lin(o, params["w_out"], params["b_out"])


# ----------------------------------------------------------------------------
def make_params(key, hidden_dim):
    names = [
        ("wq", (hidden_dim, hidden_dim)), ("bq", (hidden_dim,)),
        ("wk", (hidden_dim, hidden_dim)), ("bk", (hidden_dim,)),
        ("wv", (hidden_dim, hidden_dim)), ("bv", (hidden_dim,)),
        ("w_in_q", (hidden_dim, hidden_dim)), ("b_in_q", (hidden_dim,)),
        ("w_in_k", (hidden_dim, hidden_dim)), ("b_in_k", (hidden_dim,)),
        ("w_in_v", (hidden_dim, hidden_dim)), ("b_in_v", (hidden_dim,)),
        ("w_out", (hidden_dim, hidden_dim)), ("b_out", (hidden_dim,)),
    ]
    keys = jax.random.split(key, len(names))
    params = {}
    for (name, shape), k in zip(names, keys):
        params[name] = 0.1 * jax.random.normal(k, shape, dtype=jnp.float32)
    return params


if __name__ == "__main__":
    B, L, D, num_heads = 2, 8, 32, 4

    root = jax.random.PRNGKey(0)
    k_p, k_src, k_tgt = jax.random.split(root, 3)
    params = make_params(k_p, D)
    folded = fold_params(params, num_heads)

    src = jax.random.normal(k_src, (B, L, D), dtype=jnp.float32)
    tgt = jax.random.normal(k_tgt, (B, L, D), dtype=jnp.float32)
    # mask: (B, L, 1) bool, True == valid; pad out the last two keys of batch 1
    mask = jnp.ones((B, L, 1), dtype=bool)
    mask = mask.at[1, -2:, 0].set(False)

    out = self_attention_block_forward(folded, src, tgt, mask, num_heads)
    out = jax.block_until_ready(out)

    ref = reference_forward(params, src, tgt, mask, num_heads)
    assert out.shape == (B, L, D)
    err = float(jnp.max(jnp.abs(out - ref)))
    assert jnp.allclose(out, ref, rtol=1e-4, atol=1e-4), (
        "mismatch vs reference: max abs err = %e" % err)

    print("KERNEL_OK")
</pallas_src>

<mosaic_0001>
module attributes {stable_mosaic.version = 11 : i64} {
  func.func @fused_self_attention_kernel(%arg0: i32, %arg1: i32, %arg2: memref<1x8x32xf32, #tpu.memory_space<vmem>>, %arg3: memref<1x8x32xf32, #tpu.memory_space<vmem>>, %arg4: memref<1x1x8xf32, #tpu.memory_space<vmem>>, %arg5: memref<32x32xf32, #tpu.memory_space<vmem>>, %arg6: memref<1x32xf32, #tpu.memory_space<vmem>>, %arg7: memref<32x64xf32, #tpu.memory_space<vmem>>, %arg8: memref<1x64xf32, #tpu.memory_space<vmem>>, %arg9: memref<32x32xf32, #tpu.memory_space<vmem>>, %arg10: memref<1x32xf32, #tpu.memory_space<vmem>>, %arg11: memref<1x8x32xf32, #tpu.memory_space<vmem>>, %arg12: memref<8x64xf32, #tpu.memory_space<vmem>>) attributes {dimension_semantics = [#tpu.dimension_semantics<parallel>, #tpu.dimension_semantics<arbitrary>], iteration_bounds = array<i64: 2, 1>, scalar_prefetch = 0 : i64, scratch_operands = 1 : i64, tpu.core_type = #tpu.core_type<tc>, window_params = [{transform_indices = @transform_0, window_bounds = array<i64: 1, 8, 32>}, {transform_indices = @transform_1, window_bounds = array<i64: 1, 8, 32>}, {transform_indices = @transform_2, window_bounds = array<i64: 1, 1, 8>}, {pipeline_mode = #tpu.pipeline_mode<synchronous>, transform_indices = @transform_3, window_bounds = array<i64: 32, 32>}, {pipeline_mode = #tpu.pipeline_mode<synchronous>, transform_indices = @transform_4, window_bounds = array<i64: 1, 32>}, {pipeline_mode = #tpu.pipeline_mode<synchronous>, transform_indices = @transform_5, window_bounds = array<i64: 32, 64>}, {pipeline_mode = #tpu.pipeline_mode<synchronous>, transform_indices = @transform_6, window_bounds = array<i64: 1, 64>}, {pipeline_mode = #tpu.pipeline_mode<synchronous>, transform_indices = @transform_7, window_bounds = array<i64: 32, 32>}, {pipeline_mode = #tpu.pipeline_mode<synchronous>, transform_indices = @transform_8, window_bounds = array<i64: 1, 32>}, {transform_indices = @transform_9, window_bounds = array<i64: 1, 8, 32>}]} {
    %c0_i32 = arith.constant 0 : i32
    %0 = arith.cmpi eq, %arg1, %c0_i32 : i32
    %1 = arith.extui %0 : i1 to i32
    %c0_i32_0 = arith.constant 0 : i32
    %2 = arith.cmpi ne, %1, %c0_i32_0 : i32
    scf.if %2 {
      %c0_25 = arith.constant 0 : index
      %c0_26 = arith.constant 0 : index
      %c0_27 = arith.constant 0 : index
      %50 = vector.load %arg3[%c0_25, %c0_26, %c0_27] : memref<1x8x32xf32, #tpu.memory_space<vmem>>, vector<1x8x32xf32>
      %51 = vector.shape_cast %50 : vector<1x8x32xf32> to vector<8x32xf32>
      %c0_28 = arith.constant 0 : index
      %c0_29 = arith.constant 0 : index
      %52 = vector.load %arg7[%c0_28, %c0_29] : memref<32x64xf32, #tpu.memory_space<vmem>>, vector<32x64xf32>
      %cst_30 = arith.constant dense<0.000000e+00> : vector<8x64xf32>
      %53 = tpu.matmul %51, %52, %cst_30 {dimension_numbers = #tpu.dot_dimension_numbers<[1], [0], [0], [1], [0, 0, 1, 1], [], []>} : vector<8x32xf32>, vector<32x64xf32>, vector<8x64xf32> -> vector<8x64xf32>
      %c0_31 = arith.constant 0 : index
      %c0_32 = arith.constant 0 : index
      %54 = vector.load %arg8[%c0_31, %c0_32] : memref<1x64xf32, #tpu.memory_space<vmem>>, vector<1x64xf32>
      %55 = vector.broadcast %54 : vector<1x64xf32> to vector<8x64xf32>
      %56 = arith.addf %53, %55 : vector<8x64xf32>
      %c0_33 = arith.constant 0 : index
      %c0_34 = arith.constant 0 : index
      %57 = vector.load %arg12[%c0_33, %c0_34] : memref<8x64xf32, #tpu.memory_space<vmem>>, vector<8x64xf32>
      tpu.vector_store %arg12[%c0_33, %c0_34], %56 {strides = array<i32>} : memref<8x64xf32, #tpu.memory_space<vmem>>, vector<8x64xf32>,
    } else {
    }
    %c0 = arith.constant 0 : index
    %c0_1 = arith.constant 0 : index
    %c0_2 = arith.constant 0 : index
    %3 = vector.load %arg2[%c0, %c0_1, %c0_2] : memref<1x8x32xf32, #tpu.memory_space<vmem>>, vector<1x8x32xf32>
    %4 = vector.shape_cast %3 : vector<1x8x32xf32> to vector<8x32xf32>
    %c0_3 = arith.constant 0 : index
    %c0_4 = arith.constant 0 : index
    %c0_5 = arith.constant 0 : index
    %5 = vector.load %arg4[%c0_3, %c0_4, %c0_5] : memref<1x1x8xf32, #tpu.memory_space<vmem>>, vector<1x1x8xf32>
    %6 = vector.shape_cast %5 : vector<1x1x8xf32> to vector<1x8xf32>
    %c0_6 = arith.constant 0 : index
    %c0_7 = arith.constant 0 : index
    %7 = vector.load %arg5[%c0_6, %c0_7] : memref<32x32xf32, #tpu.memory_space<vmem>>, vector<32x32xf32>
    %cst = arith.constant dense<0.000000e+00> : vector<8x32xf32>
    %8 = tpu.matmul %4, %7, %cst {dimension_numbers = #tpu.dot_dimension_numbers<[1], [0], [0], [1], [0, 0, 1, 1], [], []>} : vector<8x32xf32>, vector<32x32xf32>, vector<8x32xf32> -> vector<8x32xf32>
    %c0_8 = arith.constant 0 : index
    %c0_9 = arith.constant 0 : index
    %9 = vector.load %arg6[%c0_8, %c0_9] : memref<1x32xf32, #tpu.memory_space<vmem>>, vector<1x32xf32>
    %10 = vector.broadcast %9 : vector<1x32xf32> to vector<8x32xf32>
    %11 = arith.addf %8, %10 : vector<8x32xf32>
    %c0_10 = arith.constant 0 : index
    %c0_11 = arith.constant 0 : index
    %12 = vector.load %arg12[%c0_10, %c0_11] : memref<8x64xf32, #tpu.memory_space<vmem>>, vector<8x64xf32>
    %13 = vector.extract_strided_slice %12 {offsets = [0, 0], sizes = [8, 32], strides = [1, 1]} : vector<8x64xf32> to vector<8x32xf32>
    %14 = vector.extract_strided_slice %12 {offsets = [0, 32], sizes = [8, 32], strides = [1, 1]} : vector<8x64xf32> to vector<8x32xf32>
    %15 = vector.shape_cast %11 : vector<8x32xf32> to vector<8x4x8xf32>
    %16 = tpu.transpose %15, [1, 0, 2] : vector<8x4x8xf32> -> vector<4x8x8xf32>
    %17 = vector.shape_cast %13 : vector<8x32xf32> to vector<8x4x8xf32>
    %18 = tpu.transpose %17, [1, 0, 2] : vector<8x4x8xf32> -> vector<4x8x8xf32>
    %19 = vector.shape_cast %14 : vector<8x32xf32> to vector<8x4x8xf32>
    %20 = tpu.transpose %19, [1, 0, 2] : vector<8x4x8xf32> -> vector<4x8x8xf32>
    "tpu.trace_start"() <{level = 10 : i32, message = "hqd,hkd->hqk"}> : () -> ()
    %cst_12 = arith.constant dense<0.000000e+00> : vector<4x8x8xf32>
    %21 = tpu.matmul %16, %18, %cst_12 {dimension_numbers = #tpu.dot_dimension_numbers<[2], [2], [1], [1], [0, 0, 0, 1, 1, 1], [0], [0]>} : vector<4x8x8xf32>, vector<4x8x8xf32>, vector<4x8x8xf32> -> vector<4x8x8xf32>
    "tpu.trace_stop"() : () -> ()
    %22 = vector.shape_cast %6 : vector<1x8xf32> to vector<1x1x8xf32>
    %23 = vector.broadcast %22 : vector<1x1x8xf32> to vector<4x8x8xf32>
    %24 = arith.addf %21, %23 : vector<4x8x8xf32>
    %cst_13 = arith.constant dense<0xFF800000> : vector<4x8xf32>
    %25 = vector.multi_reduction <maximumf>, %24, %cst_13 [2] : vector<4x8x8xf32> to vector<4x8xf32>
    %26 = vector.shape_cast %25 : vector<4x8xf32> to vector<4x8x1xf32>
    %27 = vector.broadcast %26 : vector<4x8x1xf32> to vector<4x8x8xf32>
    %28 = arith.subf %24, %27 : vector<4x8x8xf32>
    %29 = math.exp %28 : vector<4x8x8xf32>
    %cst_14 = arith.constant dense<0.000000e+00> : vector<4x8xf32>
    %30 = vector.multi_reduction <add>, %29, %cst_14 [2] : vector<4x8x8xf32> to vector<4x8xf32>
    %31 = vector.shape_cast %30 : vector<4x8xf32> to vector<4x8x1xf32>
    %32 = tpu.reciprocal %31 {approx = true} : vector<4x8x1xf32> -> vector<4x8x1xf32>
    %33 = arith.mulf %31, %32 : vector<4x8x1xf32>
    %cst_15 = arith.constant 2.000000e+00 : f32
    %34 = vector.broadcast %cst_15 : f32 to vector<4x8x1xf32>
    %35 = arith.subf %34, %33 : vector<4x8x1xf32>
    %36 = arith.mulf %32, %35 : vector<4x8x1xf32>
    %37 = vector.broadcast %36 : vector<4x8x1xf32> to vector<4x8x8xf32>
    %38 = arith.mulf %29, %37 : vector<4x8x8xf32>
    "tpu.trace_start"() <{level = 10 : i32, message = "hqk,hkd->hqd"}> : () -> ()
    %cst_16 = arith.constant dense<0.000000e+00> : vector<4x8x8xf32>
    %39 = tpu.matmul %38, %20, %cst_16 {dimension_numbers = #tpu.dot_dimension_numbers<[2], [1], [1], [2], [0, 0, 0, 1, 1, 2], [0], [0]>} : vector<4x8x8xf32>, vector<4x8x8xf32>, vector<4x8x8xf32> -> vector<4x8x8xf32>
    "tpu.trace_stop"() : () -> ()
    %40 = tpu.transpose %39, [1, 0, 2] : vector<4x8x8xf32> -> vector<8x4x8xf32>
    %41 = vector.shape_cast %40 : vector<8x4x8xf32> to vector<8x32xf32>
    %c0_17 = arith.constant 0 : index
    %c0_18 = arith.constant 0 : index
    %42 = vector.load %arg9[%c0_17, %c0_18] : memref<32x32xf32, #tpu.memory_space<vmem>>, vector<32x32xf32>
    %cst_19 = arith.constant dense<0.000000e+00> : vector<8x32xf32>
    %43 = tpu.matmul %41, %42, %cst_19 {dimension_numbers = #tpu.dot_dimension_numbers<[1], [0], [0], [1], [0, 0, 1, 1], [], []>} : vector<8x32xf32>, vector<32x32xf32>, vector<8x32xf32> -> vector<8x32xf32>
    %c0_20 = arith.constant 0 : index
    %c0_21 = arith.constant 0 : index
    %44 = vector.load %arg10[%c0_20, %c0_21] : memref<1x32xf32, #tpu.memory_space<vmem>>, vector<1x32xf32>
    %45 = vector.broadcast %44 : vector<1x32xf32> to vector<8x32xf32>
    %46 = arith.addf %43, %45 : vector<8x32xf32>
    %c0_22 = arith.constant 0 : index
    %c0_23 = arith.constant 0 : index
    %c0_24 = arith.constant 0 : index
    %47 = vector.load %arg11[%c0_22, %c0_23, %c0_24] : memref<1x8x32xf32, #tpu.memory_space<vmem>>, vector<1x8x32xf32>
    %48 = vector.shape_cast %47 : vector<1x8x32xf32> to vector<8x32xf32>
    %49 = vector.shape_cast %46 : vector<8x32xf32> to vector<1x8x32xf32>
    tpu.vector_store %arg11[%c0_22, %c0_23, %c0_24], %49 {strides = array<i32>} : memref<1x8x32xf32, #tpu.memory_space<vmem>>, vector<1x8x32xf32>,
    return
  }
  func.func @transform_0(%arg0: i32, %arg1: i32) -> (i32, i32, i32) {
    %c0_i32 = arith.constant 0 : i32
    %c0_i32_0 = arith.constant 0 : i32
    return %arg0, %arg1, %c0_i32 : i32, i32, i32
  }
  func.func @transform_1(%arg0: i32, %arg1: i32) -> (i32, i32, i32) {
    %c0_i32 = arith.constant 0 : i32
    %c0_i32_0 = arith.constant 0 : i32
    %c0_i32_1 = arith.constant 0 : i32
    return %arg0, %c0_i32, %c0_i32_0 : i32, i32, i32
  }
  func.func @transform_2(%arg0: i32, %arg1: i32) -> (i32, i32, i32) {
    %c0_i32 = arith.constant 0 : i32
    %c0_i32_0 = arith.constant 0 : i32
    %c0_i32_1 = arith.constant 0 : i32
    return %arg0, %c0_i32, %c0_i32_0 : i32, i32, i32
  }
  func.func @transform_3(%arg0: i32, %arg1: i32) -> (i32, i32) {
    %c0_i32 = arith.constant 0 : i32
    %c0_i32_0 = arith.constant 0 : i32
    %c0_i32_1 = arith.constant 0 : i32
    return %c0_i32, %c0_i32_0 : i32, i32
  }
  func.func @transform_4(%arg0: i32, %arg1: i32) -> (i32, i32) {
    %c0_i32 = arith.constant 0 : i32
    %c0_i32_0 = arith.constant 0 : i32
    %c0_i32_1 = arith.constant 0 : i32
    return %c0_i32, %c0_i32_0 : i32, i32
  }
  func.func @transform_5(%arg0: i32, %arg1: i32) -> (i32, i32) {
    %c0_i32 = arith.constant 0 : i32
    %c0_i32_0 = arith.constant 0 : i32
    %c0_i32_1 = arith.constant 0 : i32
    return %c0_i32, %c0_i32_0 : i32, i32
  }
  func.func @transform_6(%arg0: i32, %arg1: i32) -> (i32, i32) {
    %c0_i32 = arith.constant 0 : i32
    %c0_i32_0 = arith.constant 0 : i32
    %c0_i32_1 = arith.constant 0 : i32
    return %c0_i32, %c0_i32_0 : i32, i32
  }
  func.func @transform_7(%arg0: i32, %arg1: i32) -> (i32, i32) {
    %c0_i32 = arith.constant 0 : i32
    %c0_i32_0 = arith.constant 0 : i32
    %c0_i32_1 = arith.constant 0 : i32
    return %c0_i32, %c0_i32_0 : i32, i32
  }
  func.func @transform_8(%arg0: i32, %arg1: i32) -> (i32, i32) {
    %c0_i32 = arith.constant 0 : i32
    %c0_i32_0 = arith.constant 0 : i32
    %c0_i32_1 = arith.constant 0 : i32
    return %c0_i32, %c0_i32_0 : i32, i32
  }
  func.func @transform_9(%arg0: i32, %arg1: i32) -> (i32, i32, i32) {
    %c0_i32 = arith.constant 0 : i32
    %c0_i32_0 = arith.constant 0 : i32
    return %arg0, %arg1, %c0_i32 : i32, i32, i32
  }
}

</mosaic_0001>

<bundles_post_ra>
// kernel: tpu_custom_call.1
= control target key start
LH: loop header
LB: loop body
LE: loop exit
PB: predicated region body
PF: predicated region fallthrough
CT: control target
= control target key end

     0   :  { %s3251_s0 = inlined_call_operand.hbm [shape: f32[2,8,32], index: 0, kind: input, shape index: {}]   ;;  %s3252_s1 = inlined_call_operand.hbm [shape: f32[2,8,32], index: 1, kind: input, shape index: {}]   ;;  %s3253_s2 = inlined_call_operand.vmem [shape: f32[2,1,8], index: 2, kind: input, shape index: {}]   ;;  %s3254_s3 = inlined_call_operand.hbm [shape: f32[32,32], index: 3, kind: input, shape index: {}]   ;;  %s3255_s4 = inlined_call_operand.vmem [shape: f32[1,32], index: 4, kind: input, shape index: {}]   ;;  %s3256_s5 = inlined_call_operand.hbm [shape: f32[32,64], index: 5, kind: input, shape index: {}]   ;;  %s3257_s6 = inlined_call_operand.vmem [shape: f32[1,64], index: 6, kind: input, shape index: {}]   ;;  %s3258_s7 = inlined_call_operand.hbm [shape: f32[32,32], index: 7, kind: input, shape index: {}]   ;;  %s3259_s8 = inlined_call_operand.vmem [shape: f32[1,32], index: 8, kind: input, shape index: {}]   ;;  %s3260_s9 = inlined_call_operand.hbm [shape: f32[2,8,32], index: 9, kind: output, shape index: {}]  }
   0x1   :  { %3268 = sst [smem:[#allocation20_spill]] %s3253_s2 }
   0x2   :  { %3269 = sst [smem:[#allocation21_spill]] %s3254_s3 }
   0x3   :  { %3270 = sst [smem:[#allocation22_spill]] %s3256_s5 }
   0x4   :  { %3271 = sst [smem:[#allocation23_spill]] %s3258_s7 }
   0x5   :  { %3272 = sst [smem:[#allocation24_spill]] %s3259_s8 }
   0x6   :  { %3273 = sst [smem:[#allocation25_spill]] %s3260_s9 }
   0x7   :  { %14 = vsyncpa [#allocation4], 0 }
   0x8   :  { %16 = vsyncpa [#allocation4 + $0x1], 0 }
   0x9   :  { %17 = vsyncpa [#allocation7], 0 }
   0xa   :  { %19 = vsyncpa [#allocation7 + $0x1], 0 }
   0xb   :  { %20 = vsyncpa [#allocation10], 0 }
   0xc   :  { %21 = vsyncpa [#allocation5], 0 }
   0xd   :  { %23 = vsyncpa [#allocation5 + $0x1], 0  ;;  %s2740_s30 = smov 0   ;;  %s2742_s10 = smov 0  }
   0xe   :  { %s2744_s11 = smov 0   ;;  %s2746_s12 = smov 0  }
   0xf   :  { %s2748_s13 = smov 0   ;;  %s2750_s14 = smov 0  }
  0x10 LB: > { %3274 = sst [smem:[#allocation18_spill]] %s2648_s30  ;;  %s2771_s15 = sadd.s32 4294967295, %s2668_s14   ;;  %s2668_s14 = sphi %s2750_s14, %s29_s14   ;;  %s2664_s13 = sphi %s2748_s13, %s3305_s13   ;;  %s2660_s12 = sphi %s2746_s12, %s3304_s12   ;;  %s2656_s11 = sphi %s2744_s11, %s3303_s11   ;;  %s2652_s10 = sphi %s2742_s10, %s3302_s10   ;;  %s2648_s30 = sphi %s2740_s30, %s3301_s30  }
  0x11   : > { %s2132_s16 = sadd.s32 4294967294, %s2668_s14   ;;  %p63_p0 = scmp.ne.s32.totalorder %s2652_s10, %s2648_s30 }
  0x12   : > { %p3262_p1 = scmp.eq.s32.totalorder %s2771_s15, 0  ;;  %p273_p3 = scmp.eq.s32.totalorder %s2132_s16, 1 }
  0x13   : > { %p2133_p5 = scmp.ge.s32.totalorder %s2668_s14, 1  ;;  %p280_p7 = scmp.lt.s32.totalorder %s2668_s14, 3 }
  0x14   : > { %p2780_p4 = por %p3262_p1, %p63_p0  ;;  %p2785_p6 = por %p273_p3, %p63_p0 }
  0x15   : > { %p2790_p8 = pnand %p2133_p5, %p280_p7  ;;  %s2670_s20 = smov [#allocation8]  }
  0x16   : > { %s3275_s17 = scalar_select %p2780_p4, 1, 0 }
  0x17   : > { %s3276_s18 = scalar_select %p2785_p6, 1, 0 }
  0x18   : > { %s3278_s19 = scalar_select %p2790_p8, 1, 0 }
  0x19   : > { %3277 = sst [smem:[#allocation19_spill]] %s3276_s18  ;;  %s292_s21 = sshll.u32 %s2670_s20, 4  ;;  %s2794_s21 = int_to_ptr.vmem [resolvable:$true] %s292_s21 }
  0x1a   : > { %p2320_p9 = pneg %p2790_p8  ;;  %s2671_s23 = smov [#allocation9]  }
  0x1b   : > { %s308_s24 = sshll.u32 %s2671_s23, 4  ;;  %s2672_s25 = smov [#allocation11]   ;;  %s2805_s24 = int_to_ptr.vmem [resolvable:$true] %s308_s24 }
  0x1c   : > { %p2801_p11 = pnand %p2320_p9, %p3262_p1  ;;  %s2807_s26 = sshll.u32 %s2672_s25, 4  ;;  %s325_s26 = int_to_ptr.vmem [resolvable:$true] %s2807_s26 }
  0x1d   : > { %s3280_s3 = sld [smem:[#allocation21_spill]] }
  0x1e   : > { %p2817_p13 = pneg %p2801_p11 }
  0x23   : > { %s2430_s29 = scalar_lea.hbm %s3280_s3, 512 }
  0x24   : > { %p2431_p12 = scmp.ne.s32.totalorder %s3280_s3, %s2430_s29  ;;  %p2437_p5 = scmp.lt.u32.totalorder %s2430_s29, %s3280_s3 }
  0x26   : > { %p2433_p0 = pnand %p2817_p13, %p2431_p12 }
  0x28   : > { %p2434_p3 = pneg %p2433_p0 }
  0x2a   : > { %p2439_p7 = pnand %p2437_p5, %p2434_p3 }
  0x2c   : > { %2442 = shalt.err (!%p2439_p7)
}
  0x2d   : > { %s2443_s27 = scalar_lea.vmem %s2794_s21, 512  ;;  %p2451_p2 = scmp.lt.s32.totalorder %s2794_s21, %s2794_s21 }
  0x2e   : > { %p2444_p9 = scmp.ne.s32.totalorder %s2794_s21, %s2443_s27  ;;  %p2452_p6 = scmp.lt.s32.totalorder %s2443_s27, %s2443_s27 }
  0x30   : > { %p2446_p10 = pnand %p2444_p9, %p2817_p13  ;;  %p2453_p12 = por %p2452_p6, %p2451_p2 }
  0x32   : > { %p2447_p1 = pneg %p2446_p10 }
  0x34   : > { %p2454_p0 = pnand %p2453_p12, %p2447_p1 }
  0x36   : > { %2457 = shalt.err (!%p2454_p0)
}
  0x37   : > { %s2673_s28 = smov 128   ;;  %s2674_s29 = smov 8  }
  0x38   : > { %2323 = dma.hbm_to_vmem [thread:$0]  (!%p2801_p11), %s3280_s3, 512, %s2794_s21, [#allocation7], %s2673_s28, %s2673_s28, %s2674_s29  }
  0x39   : > { %s3282_s5 = sld [smem:[#allocation22_spill]] }
  0x3f   : > { %s2458_s27 = scalar_lea.hbm %s3282_s5, 512 }
  0x40   : > { %p2459_p1 = scmp.ne.s32.totalorder %s3282_s5, %s2458_s27  ;;  %p2465_p10 = scmp.lt.u32.totalorder %s2458_s27, %s3282_s5 }
  0x42   : > { %p2461_p2 = pnand %p2459_p1, %p2817_p13 }
  0x44   : > { %p2462_p6 = pneg %p2461_p2 }
  0x46   : > { %p2467_p3 = pnand %p2465_p10, %p2462_p6 }
  0x48   : > { %2470 = shalt.err (!%p2467_p3)
}
  0x49   : > { %s2471_s21 = scalar_lea.vmem %s2805_s24, 512  ;;  %p2479_p12 = scmp.lt.s32.totalorder %s2805_s24, %s2805_s24 }
  0x4a   : > { %p2472_p5 = scmp.ne.s32.totalorder %s2805_s24, %s2471_s21  ;;  %p2480_p0 = scmp.lt.s32.totalorder %s2471_s21, %s2471_s21 }
  0x4c   : > { %p2474_p7 = pnand %p2472_p5, %p2817_p13  ;;  %p2481_p1 = por %p2480_p0, %p2479_p12 }
  0x4e   : > { %p2475_p9 = pneg %p2474_p7 }
  0x50   : > { %p2482_p2 = pnand %p2481_p1, %p2475_p9 }
  0x52   : > { %2485 = shalt.err (!%p2482_p2)
}
  0x53   : > { %2326 = dma.hbm_to_vmem [thread:$0]  (!%p2801_p11), %s3282_s5, 512, %s2805_s24, [#allocation10], %s2673_s28, %s2673_s28, %s2674_s29  }
  0x54   : > { %s3283_s7 = sld [smem:[#allocation23_spill]] }
  0x5a   : > { %s2486_s16 = scalar_lea.hbm %s3283_s7, 512 }
  0x5b   : > { %p2487_p6 = scmp.ne.s32.totalorder %s3283_s7, %s2486_s16  ;;  %p2493_p5 = scmp.lt.u32.totalorder %s2486_s16, %s3283_s7 }
  0x5d   : > { %p2489_p10 = pnand %p2487_p6, %p2817_p13 }
  0x5f   : > { %p2490_p3 = pneg %p2489_p10 }
  0x61   : > { %p2495_p7 = pnand %p2493_p5, %p2490_p3 }
  0x63   : > { %2498 = shalt.err (!%p2495_p7)
}
  0x64   : > { %s2499_s21 = scalar_lea.vmem %s325_s26, 512  ;;  %p2507_p1 = scmp.lt.s32.totalorder %s325_s26, %s325_s26 }
  0x65   : > { %p2500_p9 = scmp.ne.s32.totalorder %s325_s26, %s2499_s21  ;;  %p2508_p2 = scmp.lt.s32.totalorder %s2499_s21, %s2499_s21 }
  0x67   : > { %p2502_p12 = pnand %p2500_p9, %p2817_p13  ;;  %p2509_p4 = por %p2508_p2, %p2507_p1 }
  0x69   : > { %p2503_p0 = pneg %p2502_p12 }
  0x6b   : > { %p2510_p8 = pnand %p2509_p4, %p2503_p0 }
  0x6d   : > { %2513 = shalt.err (!%p2510_p8)
}
  0x6e   : > { %2329 = dma.hbm_to_vmem [thread:$0]  (!%p2801_p11), %s3283_s7, 512, %s325_s26, [#allocation10], %s2673_s28, %s2673_s28, %s2674_s29  }
  0x6f   : > { %s50_s18 = sadd.s32 1, %s2656_s11  ;;  %s41_s22 = sadd.s32 1, %s2664_s13 }
  0x70   : > { %p57_p4 = scmp.ne.s32.totalorder %s2656_s11, %s2652_s10  ;;  %p43_p8 = scmp.ge.s32.totalorder %s41_s22, 2 }
  0x71   : > { %p58_p13 = scmp.eq.s32.totalorder %s2668_s14, 0  ;;  %p3284_p6 = scmp.eq.s32.totalorder %s2771_s15, 1 }
  0x72   : > { %p2344_p3 = scmp.lt.s32.totalorder %s2668_s14, 2  ;;  %s3307_s22 = smov (%p43_p8, %s41_s22), 0 }
  0x73   : > { %p2896_p10 = por %p3284_p6, %p57_p4  ;;  %p59_p5 = por %p58_p13, %p57_p4 }
  0x74   : > { %s341_s9 = sand.u32 1, %s2656_s11   ;;  %s45_s30 = ssub.s32 %s2664_s13, %s3307_s22 }
  0x75   : > { %s3285_s8 = scalar_select %p2896_p10, 1, 0 }
  0x76   : > { %p48_p11 = scmp.eq.s32.totalorder %s45_s30, 0  ;;  %s2906_s26 = sshll.u32 %s341_s9, 3 }
  0x77   : > { %s2139_s28 = sshll.u32 %s2664_s13, 7  ;;  %s345_s25 = scalar_lea.vmem [#allocation3], %s2906_s26 }
  0x78   : > { %s2910_s29 = scalar_select %p48_p11, %s2656_s11, %s50_s18  }
  0x79   : > { %s2915_s23 = scalar_lea.hbm %s3251_s0, %s2139_s28  ;;  %s353_s27 = sshll.u32 %s345_s25, 4  ;;  %s2918_s27 = int_to_ptr.vmem [resolvable:$true] %s353_s27 }
  0x7a   : > { %p2922_p7 = pnand %p2344_p3, %p59_p5  ;;  %s2929_s18 = scalar_lea.hbm %s3252_s1, %s2139_s28 }
  0x7b   : > { %s360_s30 = sand.u32 1, %s2668_s14   ;;  %s342_s16 = scalar_lea.sflag [#allocation4], %s341_s9 }
  0x7c   : > { %s2514_s20 = scalar_lea.hbm %s2915_s23, 128  ;;  %p2516_p12 = pneg %p2922_p7 }
  0x7d   : > { %p2515_p9 = scmp.ne.s32.totalorder %s2915_s23, %s2514_s20  ;;  %s2519_s5 = scalar_lea.hbm %s3251_s0, 256 }
  0x7e   : > { %p2520_p2 = scmp.lt.u32.totalorder %s2915_s23, %s3251_s0  ;;  %p2521_p4 = scmp.lt.u32.totalorder %s2519_s5, %s2514_s20 }
  0x7f   : > { %p2517_p0 = pnand %p2516_p12, %p2515_p9  ;;  %p2523_p13 = scmp.lt.u32.totalorder %s2514_s20, %s2915_s23 }
  0x80   : > { %p2522_p8 = por %p2521_p4, %p2520_p2 }
  0x81   : > { %p2518_p1 = pneg %p2517_p0 }
  0x82   : > { %p2524_p6 = por %p2523_p13, %p2522_p8 }
  0x84   : > { %p2525_p3 = pnand %p2524_p6, %p2518_p1 }
  0x86   : > { %2528 = shalt.err (!%p2525_p3)
}
  0x87   : > { %s2529_s9 = scalar_lea.vmem %s2918_s27, 128  ;;  %s2675_s3 = smov [#allocation3]  }
  0x88   : > { %p2530_p5 = scmp.ne.s32.totalorder %s2918_s27, %s2529_s9  ;;  %s2534_s28 = sshll.u32 %s2675_s3, 4  ;;  %s2535_s28 = int_to_ptr.vmem [resolvable:$false] %s2534_s28 }
  0x89   : > { %s2536_s7 = scalar_lea.vmem %s2535_s28, 256  ;;  %p2537_p0 = scmp.lt.s32.totalorder %s2918_s27, %s2535_s28 }
  0x8a   : > { %p2532_p11 = pnand %p2530_p5, %p2516_p12  ;;  %p2538_p2 = scmp.lt.s32.totalorder %s2536_s7, %s2529_s9 }
  0x8c   : > { %p2533_p9 = pneg %p2532_p11  ;;  %p2539_p4 = por %p2538_p2, %p2537_p0 }
  0x8e   : > { %p2540_p8 = pnand %p2539_p4, %p2533_p9 }
  0x90   : > { %2543 = shalt.err (!%p2540_p8)
}
  0x91   : > { %2333 = dma.hbm_to_vmem [thread:$0]  (!%p2922_p7), %s2915_s23, 128, %s2918_s27, %s342_s16  }
  0x92   : > { %s364_s5 = scalar_lea.vmem [#allocation6], %s2906_s26  ;;  %s361_s20 = scalar_lea.sflag [#allocation7], %s360_s30 }
  0x93   : > { %s371_s2 = sshll.u32 %s364_s5, 4  ;;  %s2544_s25 = scalar_lea.hbm %s2929_s18, 128  ;;  %s372_s2 = int_to_ptr.vmem [resolvable:$true] %s371_s2 }
  0x94   : > { %p2545_p1 = scmp.ne.s32.totalorder %s2929_s18, %s2544_s25  ;;  %s2549_s3 = scalar_lea.hbm %s3252_s1, 256 }
  0x95   : > { %p2550_p3 = scmp.lt.u32.totalorder %s2929_s18, %s3252_s1  ;;  %p2551_p5 = scmp.lt.u32.totalorder %s2549_s3, %s2544_s25 }
  0x96   : > { %p2547_p13 = pnand %p2545_p1, %p2516_p12  ;;  %p2553_p9 = scmp.lt.u32.totalorder %s2544_s25, %s2929_s18 }
  0x97   : > { %p2552_p11 = por %p2551_p5, %p2550_p3 }
  0x98   : > { %p2548_p6 = pneg %p2547_p13 }
  0x99   : > { %p2554_p0 = por %p2553_p9, %p2552_p11 }
  0x9b   : > { %p2555_p2 = pnand %p2554_p0, %p2548_p6 }
  0x9d   : > { %2558 = shalt.err (!%p2555_p2)
}
  0x9e   : > { %s2559_s26 = scalar_lea.vmem %s372_s2, 128  ;;  %s2676_s23 = smov [#allocation6]  }
  0x9f   : > { %p2560_p4 = scmp.ne.s32.totalorder %s372_s2, %s2559_s26  ;;  %s2564_s27 = sshll.u32 %s2676_s23, 4  ;;  %s2565_s27 = int_to_ptr.vmem [resolvable:$false] %s2564_s27 }
  0xa0   : > { %s2566_s30 = scalar_lea.vmem %s2565_s27, 256  ;;  %p2567_p13 = scmp.lt.s32.totalorder %s372_s2, %s2565_s27 }
  0xa1   : > { %p2562_p8 = pnand %p2560_p4, %p2516_p12  ;;  %p2568_p10 = scmp.lt.s32.totalorder %s2566_s30, %s2559_s26 }
  0xa3   : > { %p2563_p1 = pneg %p2562_p8  ;;  %p2569_p3 = por %p2568_p10, %p2567_p13 }
  0xa5   : > { %p2570_p5 = pnand %p2569_p3, %p2563_p1 }
  0xa7   : > { %2573 = shalt.err (!%p2570_p5)
}
  0xa8   : > { %2336 = dma.hbm_to_vmem [thread:$0]  (!%p2922_p7), %s2929_s18, 128, %s372_s2, %s361_s20  }
  0xa9   : > { %p3287_p6 = scmp.ne.s32.totalorder %s3278_s19, 0 }
  0xaa   : > { %s2982_s16 = sand.u32 (!%p3287_p6), 1, %s2652_s10   ;;  %p3288_p10 = scmp.ne.s32.totalorder (!%p3287_p6), %s3275_s17, 0 }
  0xab   : > { %386 = sbr.rel (%p3287_p6) target bundleno = 1691 (0x69b), region = 56  ;;  %s2985_s5 = sshll.u32 (!%p3287_p6), %s2982_s16, 3 }
  0xac   : > { %s389_s25 = scalar_lea.sflag (!%p3287_p6), [#allocation4], %s2982_s16  ;;  %s392_s24 = scalar_lea.vmem (!%p3287_p6), [#allocation3], %s2985_s5 }
  0xb2   : > { %2627 = dma.done.wait (%p3288_p10), %s389_s25, 128  }
  0xb3   : > { %2629 = vsyncadd (%p3288_p10), %s389_s25, 4294967168  ;;  %s397_s19 = sand.u32 1, %s2771_s15   ;;  %s401_s18 = scalar_lea.vmem [#allocation6], %s2985_s5 }
  0xb4   : > { %s398_s21 = scalar_lea.sflag [#allocation7], %s397_s19 }
  0xb5   : > { %2631 = dma.done.wait (%p3288_p10), %s398_s21, 128  }
  0xb6   : > { %2633 = vsyncadd (%p3288_p10), %s398_s21, 4294967168  ;;  %p3289_p7 = scmp.eq.s32.totalorder %s2771_s15, 0 }
  0xb8   : > { %2635 = dma.done.wait (%p3289_p7), [#allocation7], 512   ;;  %p3290_p12 = pmov %p3289_p7 }
  0xb9   : > { %p3291_p11 = pmov %p3289_p7 }
  0xba   : > { %2637 = vsyncadd (%p3290_p12), [#allocation7], 4294966784 }
  0xbb   : > { %2639 = dma.done.wait (%p3291_p11), [#allocation10], 1024   ;;  %p3292_p9 = pmov %p3289_p7 }
  0xbc   : > { %v2677_v0 = vmov 0.0|0.0   ;;  %vm2678_vm0 = vmmov 0   ;;  %v2679_v1 = vmov 0.0   ;;  %v464_v2 = vld [vmem:[#allocation9] sm:$0xff]  ;;  %v465_v3 = vld [vmem:[#allocation9 + $0x8] sm:$0xff]  ;;  %v466_v4 = vld [vmem:[#allocation9 + $0x10] sm:$0xff]  ;;  %v654_v28 = vlaneseq }
  0xbd   : > { %2641 = vsyncadd (%p3292_p9), [#allocation10], 4294966272  ;;  %2284 = vmatprep.subr.bf16.mxu0 %v2677_v0  ;;  %2290 = vmatprep.subr.bf16.mxu1 %v2677_v0  ;;  %v2285_v5 = vpack.c.bf16 %v465_v3, %v464_v2  ;;  %v467_v6 = vld [vmem:[#allocation9 + $0x18] sm:$0xff]  ;;  %v553_v7 = vld [vmem:[#allocation8] sm:$0xff]  ;;  %vm475_vm1 = vcmask 261120   ;;  %vm549_vm2 = vcmask 523264  }
  0xbe   : > { %2219 = vmatprep.mubr.msk.f32.mxu0 %vm2678_vm0, %v2679_v1  ;;  %2230 = vmatprep.mubr.msk.f32.mxu1 %vm2678_vm0, %v2679_v1  ;;  %v554_v8 = vld [vmem:[#allocation8 + $0x8] sm:$0xff]  ;;  %v555_v10 = vld [vmem:[#allocation8 + $0x10] sm:$0xff]  ;;  %v556_v11 = vld [vmem:[#allocation8 + $0x18] sm:$0xff]  ;;  %v2288_v12 = vpack.c.bf16 %v467_v6, %v466_v4  ;;  %s2680_s9 = smov 120   ;;  %s2681_s3 = smov 104   ;;  %v655_v32 = vshrl.u32 %v654_v28, 7 }
  0xbf   : > { %v2291_v9 = vpack.c.bf16 %v554_v8, %v553_v7  ;;  %2286 = vmatpush3.bf16.msra.mxu0 %v2285_v5  ;;  %v2294_v13 = vpack.c.bf16 %v556_v11, %v555_v10  ;;  %v463_v14 = vld [vmem:[%s401_s18] sm:$0xff]  ;;  %v551_v15 = vld [vmem:[%s392_s24] sm:$0xff]  ;;  %s2682_s28 = smov 112   ;;  %v2683_v26 = vmov 1983009808   ;;  %vm1085_vm3 = vcmask 64512  }
  0xc0   : > { %2287 = vmatprep.subr.bf16.mxu0 %v2677_v0  ;;  %v2149_v16 = vld [vmem:[%s3257_s6] ss:$0 sm:$0xff]  ;;  %v652_v27 = vunpack.c.l.s4 %v2683_v26  ;;  %v2684_v29 = vmov 1934713408   ;;  %p456_p0 = scmp.lt.s32.totalorder %s2660_s12, 1  ;;  %s3293_s27 = sld [smem:[#allocation20_spill]] }
  0xc1   : > { %2292 = vmatpush3.bf16.msra.mxu1 %v2291_v9  ;;  %v2151_v17 = vld [vmem:[%s3255_s4] ss:$0 sm:$0xff]  ;;  %v684_v30 = vunpack.c.l.s4 %v2684_v29  ;;  %s2685_s25 = smov 96   ;;  %s2686_s24 = smov 16   ;;  %vm1887_vm4 = vcmask 130048   ;;  %vm1889_vm5 = vcmask 195584  }
  0xc2   : > { %2293 = vmatprep.subr.bf16.mxu1 %v2677_v0  ;;  %v653_v31 = vunpack.c.0.s8 %v652_v27  ;;  %s457_s7 = scalar_select %p456_p0, %s2660_s12, 1 }
  0xc3   : > { %2289 = vmatpush3.bf16.msra.mxu0 %v2288_v12  ;;  %v685_v35 = vunpack.c.0.s8 %v684_v30  ;;  %s2687_s19 = smov 8   ;;  %s2688_s21 = smov 24  }
  0xc4   : > { %2243 = vmatprep.subr.mxu0 %v2679_v1  ;;  %v3042_v36 = vsub.s32 %v653_v31, %v655_v32  ;;  %s3294_s17 = sld [smem:[#allocation24_spill]]  ;;  %s2177_s2 = sshll.u32 %s2660_s12, 7 }
  0xc5   : > { %2295 = vmatpush3.bf16.msra.mxu1 %v2294_v13  ;;  %v3054_v43 = vsub.s32 %v685_v35, %v655_v32  ;;  %s455_s20 = scalar_lea.vmem [#allocation12], %s2985_s5  ;;  %s1977_s23 = scalar_lea.sflag [#allocation5], %s2982_s16 }
  0xc6   : > { %2233 = vmatprep.subr.mxu1 %v2679_v1  ;;  %2220 = vmatmul.mubr.msk.f32.vlgmr.msra.gmra.mrb[0].mxu0 %vm475_vm1, %v463_v14  ;;  %s458_s30 = scalar_lea.vmem %s3293_s27, %s457_s7  ;;  %s3295_s7 = sld [smem:[#allocation25_spill]] }
  0xc7   : > { %2245 = vmatprep.mubr.msk.f32.mxu0 %vm2678_vm0, %v2679_v1  ;;  %p3296_p4 = scmp.ne.s32.totalorder %s3285_s8, 0  ;;  %s2689_s12 = smov [#allocation12]  }
  0xc8   : > { %2231 = vmatmul.mubr.msk.f32.vlgmr.msra.gmra.mrb[0].mxu1 %vm475_vm1, %v551_v15  ;;  %s2578_s5 = sshll.u32 %s2689_s12, 4  ;;  %s2579_s5 = int_to_ptr.vmem [resolvable:$false] %s2578_s5 }
  0xc9   : > { %2235 = vmatprep.mubr.msk.f32.mxu1 %vm2678_vm0, %v2679_v1 }
  0xcc   : > { %s3201_s26 = scalar_lea.hbm %s3295_s7, %s2177_s2 }
 0x199   : > { %v545_v18 = vpop.f32.mrb[0].mxu0 }
 0x19a   : > { %v546_v19 = vadd.f32 %v2149_v16, %v545_v18  ;;  %v2221_v20 = vpop.f32.mrb[1].mxu0 }
 0x19b   : > { %v634_v21 = vpop.f32.mrb[0].mxu1 }
 0x19c   : > { %v635_v22 = vadd.f32 %v2151_v17, %v634_v21  ;;  %v2232_v23 = vpop.f32.mrb[1].mxu1  ;;  %550 = vst.msk [vmem:[#allocation2] sm:$0xff] %vm549_vm2, %v546_v19 }
 0x19e   : > { %640 = vrot.lane.b32.xlu1 %v635_v22, %s2680_s9 }
 0x1a3   : > { %v3033_v24 = vld [vmem:[#allocation2] sm:$0xff] }
 0x1a4   : > { %792 = vrot.lane.b32.xlu1 %v3033_v24, %s2681_s3  ;;  %786 = vrot.lane.b32.xlu0 %v3033_v24, %s2680_s9  ;;  %s1991_s9 = sshll.u32 %s455_s20, 4  ;;  %s3203_s9 = int_to_ptr.vmem [resolvable:$true] %s1991_s9 }
 0x1a5   : > { %s2574_s27 = scalar_lea.vmem %s3203_s9, 128  ;;  %p2581_p13 = scmp.lt.s32.totalorder %s3203_s9, %s2579_s5 }
 0x1a6   : > { %p2575_p2 = scmp.ne.s32.totalorder %s3203_s9, %s2574_s27 }
 0x1a8   : > { %646 = vrot.lane.b32.xlu1 %v635_v22, %s2681_s3  ;;  %789 = vrot.lane.b32.xlu0 %v3033_v24, %s2682_s28  ;;  %p2576_p8 = pnand %p2575_p2, %p3296_p4 }
 0x1aa   : > { %p2577_p1 = pneg %p2576_p8 }
 0x1ac   : > { %643 = vrot.lane.b32.xlu0 %v635_v22, %s2682_s28 }
 0x210   : > { %v641_v25 = vpop.permute.xlu1 %640 }
 0x216   : > { %v3038_v33 = vpop.permute.xlu1 %792  ;;  %v3040_v34 = vpop.permute.xlu0 %786 }
 0x217   : > { %v811_v37 = vcombine.low %v3040_v34, %v3038_v33  ;;  %v812_v38 = vcombine.high %v3040_v34, %v3038_v33 }
 0x219   : > { %v819_v44 = vrot.slane %v811_v37, %v3042_v36  ;;  %v826_v45 = vrot.slane %v812_v38, %v3042_v36 }
 0x21a   : > { %v3048_v39 = vpop.permute.xlu0 %789  ;;  %v647_v40 = vpop.permute.xlu1 %646 }
 0x21b   : > { %v795_v41 = vcombine.low %v3033_v24, %v3048_v39  ;;  %v796_v42 = vcombine.high %v3033_v24, %v3048_v39  ;;  %v665_v48 = vcombine.low %v641_v25, %v647_v40  ;;  %v666_v49 = vcombine.high %v641_v25, %v647_v40 }
 0x21d   : > { %v803_v46 = vrot.slane %v795_v41, %v3042_v36  ;;  %v810_v47 = vrot.slane %v796_v42, %v3042_v36  ;;  %v673_v61 = vrot.slane %v665_v48, %v3042_v36  ;;  %v680_v62 = vrot.slane %v666_v49, %v3042_v36 }
 0x21e   : > { %v644_v50 = vpop.permute.xlu0 %643 }
 0x21f   : > { %v827_v51 = vcombine.low %v803_v46, %v819_v44  ;;  %v828_v52 = vcombine.high %v803_v46, %v819_v44  ;;  %v843_v53 = vcombine.low %v810_v47, %v826_v45  ;;  %v844_v54 = vcombine.high %v810_v47, %v826_v45 }
 0x220   : > { %v649_v55 = vcombine.low %v635_v22, %v644_v50  ;;  %v650_v56 = vcombine.high %v635_v22, %v644_v50 }
 0x221   : > { %v835_v57 = vrot.slane %v827_v51, %v3054_v43  ;;  %v842_v58 = vrot.slane %v828_v52, %v3054_v43  ;;  %v851_v59 = vrot.slane %v843_v53, %v3054_v43  ;;  %v858_v60 = vrot.slane %v844_v54, %v3054_v43 }
 0x222   : > { %v657_v63 = vrot.slane %v649_v55, %v3042_v36  ;;  %v664_v2 = vrot.slane %v650_v56, %v3042_v36 }
 0x223   : > { %v863_v3 = vcombine.low %v835_v57, %v842_v58  ;;  %v2155_v4 = vcombine.high %v835_v57, %v842_v58  ;;  %v879_v5 = vcombine.low %v851_v59, %v858_v60  ;;  %v2156_v6 = vcombine.high %v851_v59, %v858_v60  ;;  %v2159_v57 = vld [vmem:[%s458_s30] ss:$0 sm:$0xff]  ;;  %s2580_s30 = scalar_lea.vmem %s2579_s5, 256 }
 0x224   : > { %v681_v7 = vcombine.low %v657_v63, %v673_v61  ;;  %v682_v8 = vcombine.high %v657_v63, %v673_v61  ;;  %v697_v9 = vcombine.low %v664_v2, %v680_v62  ;;  %v698_v10 = vcombine.high %v664_v2, %v680_v62  ;;  %p2582_p3 = scmp.lt.s32.totalorder %s2580_s30, %s2574_s27 }
 0x225   : > { %v870_v11 = vrot.slane %v863_v3, %v3042_v36  ;;  %v878_v12 = vrot.slane %v2155_v4, %v3042_v36  ;;  %v886_v13 = vrot.slane %v879_v5, %v3042_v36  ;;  %v894_v14 = vrot.slane %v2156_v6, %v3042_v36 }
 0x226   : > { %v689_v15 = vrot.slane %v681_v7, %v3054_v43  ;;  %v696_v16 = vrot.slane %v682_v8, %v3054_v43  ;;  %v705_v17 = vrot.slane %v697_v9, %v3054_v43  ;;  %v712_v18 = vrot.slane %v698_v10, %v3054_v43  ;;  %p2583_p5 = por %p2582_p3, %p2581_p13 }
 0x227   : > { %v895_v19 = vcombine.low %v870_v11, %v878_v12  ;;  %v896_v20 = vcombine.high %v870_v11, %v878_v12  ;;  %v911_v21 = vcombine.low %v886_v13, %v894_v14  ;;  %v912_v22 = vcombine.high %v886_v13, %v894_v14 }
 0x228   : > { %v717_v23 = vcombine.low %v689_v15, %v696_v16  ;;  %v2153_v25 = vcombine.high %v689_v15, %v696_v16  ;;  %v733_v26 = vcombine.low %v705_v17, %v712_v18  ;;  %v2154_v27 = vcombine.high %v705_v17, %v712_v18  ;;  %p2584_p6 = pnand %p2583_p5, %p2577_p1 }
 0x229   : > { %v903_v28 = vrot.slane %v895_v19, %v3054_v43  ;;  %v919_v29 = vrot.slane %v911_v21, %v3054_v43  ;;  %v910_v30 = vrot.slane %v896_v20, %v3054_v43  ;;  %v926_v31 = vrot.slane %v912_v22, %v3054_v43 }
 0x22a   : > { %v724_v32 = vrot.slane %v717_v23, %v3042_v36  ;;  %v732_v35 = vrot.slane %v2153_v25, %v3042_v36  ;;  %v740_v37 = vrot.slane %v733_v26, %v3042_v36  ;;  %v748_v38 = vrot.slane %v2154_v27, %v3042_v36 }
 0x22b   : > { %v927_v40 = vcombine.low %v903_v28, %v919_v29  ;;  %v929_v41 = vcombine.low %v910_v30, %v926_v31  ;;  %v928_v53 = vcombine.high %v903_v28, %v919_v29  ;;  %v930_v55 = vcombine.high %v910_v30, %v926_v31 }
 0x22c   : > { %v749_v42 = vcombine.low %v724_v32, %v732_v35  ;;  %v750_v44 = vcombine.high %v724_v32, %v732_v35  ;;  %v765_v45 = vcombine.low %v740_v37, %v748_v38  ;;  %v766_v46 = vcombine.high %v740_v37, %v748_v38 }
 0x22d   : > { %2234 = vmatpush3.xpose.msk.msra.mxu1 %vm1085_vm3, %v927_v40  ;;  %2244 = vmatpush3.xpose.msk.msra.mxu0 %vm1085_vm3, %v929_v41 }
 0x22e   : > { %2238 = vmatprep.subr.mxu1 %v2679_v1  ;;  %v757_v47 = vrot.slane %v749_v42, %v3054_v43  ;;  %v773_v48 = vrot.slane %v765_v45, %v3054_v43  ;;  %v764_v49 = vrot.slane %v750_v44, %v3054_v43  ;;  %v780_v50 = vrot.slane %v766_v46, %v3054_v43 }
 0x22f   : > { %2253 = vmatprep.subr.mxu0 %v2679_v1 }
 0x230   : > { %v781_v51 = vcombine.low %v757_v47, %v773_v48  ;;  %v783_v52 = vcombine.low %v764_v49, %v780_v50  ;;  %v782_v54 = vcombine.high %v757_v47, %v773_v48  ;;  %v784_v56 = vcombine.high %v764_v49, %v780_v50 }
 0x232   : > { %2236 = vmatmul.mubr.msk.f32.vlgmr.msra.gmra.mrb[2].mxu1 %vm1085_vm3, %v781_v51  ;;  %2246 = vmatmul.mubr.msk.f32.vlgmr.msra.gmra.mrb[2].mxu0 %vm1085_vm3, %v783_v52 }
 0x233   : > { %2239 = vmatpush3.xpose.msk.msra.mxu1 %vm1085_vm3, %v928_v53  ;;  %2240 = vmatprep.mubr.msk.f32.mxu1 %vm2678_vm0, %v2679_v1 }
 0x234   : > { %2248 = vmatprep.subr.mxu1 %v2679_v1  ;;  %2255 = vmatprep.mubr.msk.f32.mxu0 %vm2678_vm0, %v2679_v1 }
 0x236   : > { %2241 = vmatmul.mubr.msk.f32.vlgmr.msra.gmra.mrb[4].mxu1 %vm1085_vm3, %v782_v54 }
 0x237   : > { %2249 = vmatpush3.xpose.msk.msra.mxu1 %vm1085_vm3, %v930_v55  ;;  %2250 = vmatprep.mubr.msk.f32.mxu1 %vm2678_vm0, %v2679_v1 }
 0x238   : > { %2258 = vmatprep.subr.mxu1 %v2679_v1 }
 0x23a   : > { %2251 = vmatmul.mubr.msk.f32.vlgmr.msra.gmra.mrb[6].mxu1 %vm1085_vm3, %v784_v56 }
 0x23b   : > { %2260 = vmatprep.mubr.msk.f32.mxu1 %vm2678_vm0, %v2679_v1 }
 0x305   : > { %v1158_v58 = vpop.f32.mrb[2].mxu1  ;;  %v1310_v59 = vpop.f32.mrb[2].mxu0 }
 0x306   : > { %v1159_v60 = vadd.f32 %v2159_v57, %v1158_v58  ;;  %v2237_v61 = vpop.f32.mrb[3].mxu1  ;;  %v2247_v62 = vpop.f32.mrb[3].mxu0  ;;  %v1311_v63 = vadd.f32 %v2159_v57, %v1310_v59 }
 0x308   : > { %v1390_v2 = vsel %vm1085_vm3, %v1159_v60, -inf  ;;  %v1396_v7 = vsel %vm1085_vm3, %v1311_v63, -inf }
 0x309   : > { %1391 = vmax.xlane.f32.xlu0 %v1390_v2  ;;  %v1234_v3 = vpop.f32.mrb[4].mxu1 }
 0x30a   : > { %v1235_v4 = vadd.f32 %v2159_v57, %v1234_v3  ;;  %v2242_v5 = vpop.f32.mrb[5].mxu1 }
 0x30c   : > { %v1393_v6 = vsel %vm1085_vm3, %v1235_v4, -inf }
 0x30d   : > { %1394 = vmax.xlane.f32.xlu1 %v1393_v6  ;;  %v1386_v8 = vpop.f32.mrb[6].mxu1  ;;  %1397 = vmax.xlane.f32.xlu0 %v1396_v7 }
 0x30e   : > { %v1387_v9 = vadd.f32 %v2159_v57, %v1386_v8  ;;  %v2252_v10 = vpop.f32.mrb[7].mxu1 }
 0x310   : > { %v1399_v11 = vsel %vm1085_vm3, %v1387_v9, -inf }
 0x311   : > { %1400 = vmax.xlane.f32.xlu0 %v1399_v11 }
 0x31e   : > { %931 = vrot.lane.b32.xlu1 %v3033_v24, %s2685_s25 }
 0x396   : > { %v1392_v12 = vpop.xlane.xlu0 %1391 }
 0x397   : > { %v1402_v13 = vsub.f32 %v1159_v60, %v1392_v12 }
 0x399   : > { %v1406_v14 = vmul.f32 1.442695, %v1402_v13 }
 0x39a   : > { %v1395_v15 = vpop.xlane.xlu1 %1394  ;;  %v1398_v16 = vpop.xlane.xlu0 %1397 }
 0x39b   : > { %2414 = vpow2.f32 %v1406_v14  ;;  %v1403_v17 = vsub.f32 %v1235_v4, %v1395_v15  ;;  %v1404_v18 = vsub.f32 %v1311_v63, %v1398_v16 }
 0x39d   : > { %v1408_v19 = vmul.f32 1.442695, %v1403_v17  ;;  %v1410_v20 = vmul.f32 1.442695, %v1404_v18 }
 0x39e   : > { %v1401_v21 = vpop.xlane.xlu0 %1400  ;;  %v932_v32 = vpop.permute.xlu1 %931 }
 0x39f   : > { %2416 = vpow2.f32 %v1408_v19  ;;  %v1405_v22 = vsub.f32 %v1387_v9, %v1401_v21 }
 0x3a0   : > { %2418 = vpow2.f32 %v1410_v20 }
 0x3a1   : > { %v1412_v23 = vmul.f32 1.442695, %v1405_v22 }
 0x3a3   : > { %2420 = vpow2.f32 %v1412_v23 }
 0x3a5   : > { %v3119_v25 = vpop.eup %2414 }
 0x3a6   : > { %v1414_v24 = vsel %vm1085_vm3, %v3119_v25, 0.0 }
 0x3a7   : > { %1415 = vadd.xlane.f32.xlu1 %v1414_v24 }
 0x3a9   : > { %v3123_v26 = vpop.eup %2416 }
 0x3aa   : > { %v3125_v27 = vpop.eup %2418  ;;  %v1417_v28 = vsel %vm1085_vm3, %v3123_v26, 0.0 }
 0x3ab   : > { %1418 = vadd.xlane.f32.xlu0 %v1417_v28  ;;  %v1420_v29 = vsel %vm1085_vm3, %v3125_v27, 0.0 }
 0x3ac   : > { %1421 = vadd.xlane.f32.xlu1 %v1420_v29 }
 0x3ad   : > { %v3131_v30 = vpop.eup %2420 }
 0x3ae   : > { %v1423_v31 = vsel %vm1085_vm3, %v3131_v30, 0.0 }
 0x3af   : > { %1424 = vadd.xlane.f32.xlu0 %v1423_v31 }
 0x3bd   : > { %935 = vrot.lane.b32.xlu1 %v3048_v39, %s2685_s25 }
 0x3c1   : > { %937 = vrot.lane.b32.xlu1 %v3038_v33, %s2685_s25 }
 0x3c5   : > { %933 = vrot.lane.b32.xlu0 %v3040_v34, %s2685_s25 }
 0x434   : > { %v1416_v35 = vpop.xlane.xlu1 %1415 }
 0x435   : > { %2422 = vrcp.f32 %v1416_v35 }
 0x438   : > { %v1419_v37 = vpop.xlane.xlu0 %1418 }
 0x439   : > { %v1422_v38 = vpop.xlane.xlu1 %1421  ;;  %2424 = vrcp.f32 %v1419_v37 }
 0x43a   : > { %2426 = vrcp.f32 %v1422_v38 }
 0x43c   : > { %v1425_v40 = vpop.xlane.xlu0 %1424 }
 0x43d   : > { %v936_v41 = vpop.permute.xlu1 %935  ;;  %2428 = vrcp.f32 %v1425_v40 }
 0x43e   : > { %v943_v42 = vcombine.low %v932_v32, %v936_v41  ;;  %v944_v45 = vcombine.high %v932_v32, %v936_v41 }
 0x43f   : > { %v2423_v33 = vpop.eup %2422 }
 0x440   : > { %v934_v44 = vpop.permute.xlu0 %933  ;;  %v951_v48 = vrot.slane %v943_v42, %v3042_v36  ;;  %v958_v51 = vrot.slane %v944_v45, %v3042_v36  ;;  %v1430_v54 = vmul.f32 %v2423_v33, %v1416_v35 }
 0x441   : > { %v938_v39 = vpop.permute.xlu1 %937 }
 0x442   : > { %v959_v46 = vcombine.low %v934_v44, %v938_v39  ;;  %v960_v47 = vcombine.high %v934_v44, %v938_v39  ;;  %v1434_v4 = vsub.f32 2.0, %v1430_v54 }
 0x443   : > { %v2425_v50 = vpop.eup %2424 }
 0x444   : > { %v967_v34 = vrot.slane %v959_v46, %v3042_v36  ;;  %v974_v49 = vrot.slane %v960_v47, %v3042_v36  ;;  %v2427_v57 = vpop.eup %2426  ;;  %v1431_v58 = vmul.f32 %v2425_v50, %v1419_v37  ;;  %v1438_v16 = vmul.f32 %v2423_v33, %v1434_v4 }
 0x445   : > { %v1432_v5 = vmul.f32 %v2427_v57, %v1422_v38 }
 0x446   : > { %v975_v52 = vcombine.low %v951_v48, %v967_v34  ;;  %v976_v53 = vcombine.high %v951_v48, %v967_v34  ;;  %v991_v55 = vcombine.low %v958_v51, %v974_v49  ;;  %v992_v56 = vcombine.high %v958_v51, %v974_v49 }
 0x447   : > { %v2429_v61 = vpop.eup %2428  ;;  %v1435_v8 = vsub.f32 2.0, %v1431_v58  ;;  %v1436_v19 = vsub.f32 2.0, %v1432_v5  ;;  %v1442_v32 = vmul.f32 %v3119_v25, %v1438_v16 }
 0x448   : > { %v983_v59 = vrot.slane %v975_v52, %v3054_v43  ;;  %v990_v60 = vrot.slane %v976_v53, %v3054_v43  ;;  %v999_v62 = vrot.slane %v991_v55, %v3054_v43  ;;  %v1006_v63 = vrot.slane %v992_v56, %v3054_v43 }
 0x449   : > { %v1433_v9 = vmul.f32 %v2429_v61, %v1425_v40  ;;  %v1439_v20 = vmul.f32 %v2425_v50, %v1435_v8  ;;  %v1440_v35 = vmul.f32 %v2427_v57, %v1436_v19 }
 0x44a   : > { %v1011_v2 = vcombine.low %v983_v59, %v990_v60  ;;  %v2157_v3 = vcombine.high %v983_v59, %v990_v60  ;;  %v1027_v6 = vcombine.low %v999_v62, %v1006_v63  ;;  %v2158_v7 = vcombine.high %v999_v62, %v1006_v63  ;;  %v1893_v59 = vld [vmem:[#allocation11 + $0x10] sm:$0xff]  ;;  %v1894_v60 = vld [vmem:[#allocation11 + $0x18] sm:$0xff] }
 0x44b   : > { %v1437_v21 = vsub.f32 2.0, %v1433_v9  ;;  %v1443_v37 = vmul.f32 %v3123_v26, %v1439_v20  ;;  %v1444_v42 = vmul.f32 %v3125_v27, %v1440_v35  ;;  %v1891_v26 = vld [vmem:[#allocation11] sm:$0xff]  ;;  %v1892_v27 = vld [vmem:[#allocation11 + $0x8] sm:$0xff] }
 0x44c   : > { %v1018_v10 = vrot.slane %v1011_v2, %v3042_v36  ;;  %v1026_v11 = vrot.slane %v2157_v3, %v3042_v36  ;;  %v1034_v12 = vrot.slane %v1027_v6, %v3042_v36  ;;  %v1042_v13 = vrot.slane %v2158_v7, %v3042_v36 }
 0x44d   : > { %v1441_v38 = vmul.f32 %v2429_v61, %v1437_v21  ;;  %v2300_v3 = vpack.c.bf16 %v1894_v60, %v1893_v59 }
 0x44e   : > { %v1043_v14 = vcombine.low %v1018_v10, %v1026_v11  ;;  %v1044_v15 = vcombine.high %v1018_v10, %v1026_v11  ;;  %v1059_v17 = vcombine.low %v1034_v12, %v1042_v13  ;;  %v1060_v18 = vcombine.high %v1034_v12, %v1042_v13 }
 0x44f   : > { %v1445_v25 = vmul.f32 %v3131_v30, %v1441_v38  ;;  %v2297_v30 = vpack.c.bf16 %v1892_v27, %v1891_v26 }
 0x450   : > { %v1051_v22 = vrot.slane %v1043_v14, %v3054_v43  ;;  %v1067_v23 = vrot.slane %v1059_v17, %v3054_v43  ;;  %v1058_v24 = vrot.slane %v1044_v15, %v3054_v43  ;;  %v1074_v28 = vrot.slane %v1060_v18, %v3054_v43 }
 0x452   : > { %v1075_v29 = vcombine.low %v1051_v22, %v1067_v23  ;;  %v1076_v31 = vcombine.high %v1051_v22, %v1067_v23  ;;  %v1077_v40 = vcombine.low %v1058_v24, %v1074_v28  ;;  %v1078_v41 = vcombine.high %v1058_v24, %v1074_v28 }
 0x454   : > { %2254 = vmatpush3.msra.mxu0 %v1075_v29  ;;  %2259 = vmatpush3.msra.mxu1 %v1076_v31 }
 0x455   : > { %2256 = vmatmul.mubr.msk.f32.vlgmr.msra.gmra.mrb[4].mxu0 %vm1085_vm3, %v1442_v32  ;;  %2261 = vmatmul.mubr.msk.f32.vlgmr.msra.gmra.mrb[8].mxu1 %vm1085_vm3, %v1443_v37  ;;  %v2174_v32 = vld [vmem:[%s3294_s17] ss:$0 sm:$0xff] }
 0x456   : > { %2263 = vmatprep.subr.mxu0 %v2679_v1  ;;  %2268 = vmatprep.subr.mxu1 %v2679_v1 }
 0x457   : > { %2264 = vmatpush3.msra.mxu0 %v1077_v40  ;;  %2269 = vmatpush3.msra.mxu1 %v1078_v41 }
 0x458   : > { %2265 = vmatprep.mubr.msk.f32.mxu0 %vm2678_vm0, %v2679_v1  ;;  %2270 = vmatprep.mubr.msk.f32.mxu1 %vm2678_vm0, %v2679_v1 }
 0x459   : > { %2266 = vmatmul.mubr.msk.f32.vlgmr.msra.gmra.mrb[6].mxu0 %vm1085_vm3, %v1444_v42  ;;  %2271 = vmatmul.mubr.msk.f32.vlgmr.msra.gmra.mrb[10].mxu1 %vm1085_vm3, %v1445_v25 }
 0x45a   : > { %2296 = vmatprep.subr.bf16.mxu0 %v2677_v0  ;;  %2281 = vmatprep.mubr.msk.f32.mxu0 %vm2678_vm0, %v2679_v1 }
 0x45b   : > { %2298 = vmatpush3.bf16.msra.mxu0 %v2297_v30 }
 0x45c   : > { %2299 = vmatprep.subr.bf16.mxu0 %v2677_v0 }
 0x45f   : > { %2301 = vmatpush3.bf16.msra.mxu0 %v2300_v3 }
 0x528   : > { %v1515_v44 = vpop.f32.mrb[4].mxu0  ;;  %v1588_v45 = vpop.f32.mrb[8].mxu1 }
 0x529   : > { %v2257_v39 = vpop.f32.mrb[5].mxu0  ;;  %v2262_v46 = vpop.f32.mrb[9].mxu1 }
 0x52c   : > { %v1661_v47 = vpop.f32.mrb[6].mxu0  ;;  %v1734_v33 = vpop.f32.mrb[10].mxu1 }
 0x52d   : > { %v1738_v48 = vcombine.low %v1515_v44, %v1661_v47  ;;  %v1739_v34 = vcombine.high %v1515_v44, %v1661_v47  ;;  %v1754_v49 = vcombine.low %v1588_v45, %v1734_v33  ;;  %v1755_v50 = vcombine.high %v1588_v45, %v1734_v33  ;;  %v2267_v51 = vpop.f32.mrb[7].mxu0  ;;  %v2272_v52 = vpop.f32.mrb[11].mxu1 }
 0x52f   : > { %v1746_v1 = vrot.slane %v1738_v48, %v3042_v36  ;;  %v1753_v53 = vrot.slane %v1739_v34, %v3042_v36  ;;  %v1762_v54 = vrot.slane %v1754_v49, %v3042_v36  ;;  %v1769_v0 = vrot.slane %v1755_v50, %v3042_v36 }
 0x531   : > { %v1770_v55 = vcombine.low %v1746_v1, %v1762_v54  ;;  %v1771_v56 = vcombine.high %v1746_v1, %v1762_v54  ;;  %v1786_v57 = vcombine.low %v1753_v53, %v1769_v0  ;;  %v1787_v58 = vcombine.high %v1753_v53, %v1769_v0 }
 0x533   : > { %v1778_v61 = vrot.slane %v1770_v55, %v3054_v43  ;;  %v1785_v62 = vrot.slane %v1771_v56, %v3054_v43  ;;  %v1794_v63 = vrot.slane %v1786_v57, %v3054_v43  ;;  %v1801_v2 = vrot.slane %v1787_v58, %v3054_v43 }
 0x535   : > { %v1806_v4 = vcombine.low %v1778_v61, %v1785_v62  ;;  %v2172_v5 = vcombine.high %v1778_v61, %v1785_v62  ;;  %v1822_v6 = vcombine.low %v1794_v63, %v1801_v2  ;;  %v2173_v7 = vcombine.high %v1794_v63, %v1801_v2 }
 0x537   : > { %v1813_v8 = vrot.slane %v1806_v4, %v3042_v36  ;;  %v1821_v9 = vrot.slane %v2172_v5, %v3042_v36  ;;  %v1829_v10 = vrot.slane %v1822_v6, %v3042_v36  ;;  %v1837_v11 = vrot.slane %v2173_v7, %v3042_v36 }
 0x539   : > { %v1839_v12 = vcombine.high %v1813_v8, %v1821_v9  ;;  %v1855_v13 = vcombine.high %v1829_v10, %v1837_v11  ;;  %v1838_v14 = vcombine.low %v1813_v8, %v1821_v9  ;;  %v1854_v15 = vcombine.low %v1829_v10, %v1837_v11 }
 0x53b   : > { %v1853_v16 = vrot.slane %v1839_v12, %v3054_v43  ;;  %v1869_v17 = vrot.slane %v1855_v13, %v3054_v43  ;;  %v1846_v18 = vrot.slane %v1838_v14, %v3054_v43  ;;  %v1862_v19 = vrot.slane %v1854_v15, %v3054_v43 }
 0x53d   : > { %v1872_v20 = vcombine.low %v1853_v16, %v1869_v17  ;;  %v1871_v21 = vcombine.high %v1846_v18, %v1862_v19  ;;  %v1873_v22 = vcombine.high %v1853_v16, %v1869_v17  ;;  %v1870_v23 = vcombine.low %v1846_v18, %v1862_v19 }
 0x53f   : > { %1879 = vrot.lane.b32.xlu1 %v1872_v20, %s2686_s24  ;;  %1875 = vrot.lane.b32.xlu0 %v1871_v21, %s2687_s19 }
 0x543   : > { %1883 = vrot.lane.b32.xlu0 %v1873_v22, %s2688_s21 }
 0x5b1   : > { %v1876_v36 = vpop.permute.xlu0 %1875  ;;  %v1880_v24 = vpop.permute.xlu1 %1879 }
 0x5b2   : > { %v1886_v28 = vsel %vm1085_vm3, %v1870_v23, %v1876_v36 }
 0x5b3   : > { %v1888_v29 = vsel %vm1887_vm4, %v1886_v28, %v1880_v24 }
 0x5b5   : > { %v1884_v43 = vpop.permute.xlu0 %1883 }
 0x5b6   : > { %v1890_v31 = vsel %vm1889_vm5, %v1888_v29, %v1884_v43 }
 0x5b7   : > { %2282 = vmatmul.mubr.msk.f32.vlgmr.msra.gmra.mrb[8].mxu0 %vm475_vm1, %v1890_v31 }
 0x68a   : > { %v1971_v35 = vpop.f32.mrb[8].mxu0 }
 0x68b   : > { %v1972_v37 = vadd.f32 %v2174_v32, %v1971_v35  ;;  %v2283_v38 = vpop.f32.mrb[9].mxu0 }
 0x68d   : > { %1975 = vst.msk [vmem:[%s455_s20] sm:$0xff] %vm475_vm1, %v1972_v37 }
 0x68e   : > { %2587 = shalt.err (!%p2584_p6)
}
 0x68f   : > { %s2588_s16 = scalar_lea.hbm %s3201_s26, 128  ;;  %s2592_s19 = scalar_lea.hbm %s3295_s7, 256 }
 0x690   : > { %p2589_p10 = scmp.ne.s32.totalorder %s3201_s26, %s2588_s16  ;;  %p2593_p11 = scmp.lt.u32.totalorder %s3201_s26, %s3295_s7 }
 0x691   : > { %p2594_p9 = scmp.lt.u32.totalorder %s2592_s19, %s2588_s16  ;;  %p2596_p2 = scmp.lt.u32.totalorder %s2588_s16, %s3201_s26 }
 0x692   : > { %p2590_p7 = pnand %p2589_p10, %p3296_p4 }
 0x693   : > { %p2595_p0 = por %p2594_p9, %p2593_p11 }
 0x694   : > { %p2591_p12 = pneg %p2590_p7 }
 0x695   : > { %p2597_p8 = por %p2596_p2, %p2595_p0 }
 0x697   : > { %p2598_p1 = pnand %p2597_p8, %p2591_p12 }
 0x699   : > { %2601 = shalt.err (!%p2598_p1)
}
 0x69a   : > { %2318 = dma.vmem_to_hbm [thread:$0]  (%p3296_p4), %s3203_s9, 128, %s3201_s26, %s1977_s23  }
 0x69b PF: > { %s3297_s15 = sld [smem:[#allocation18_spill]]  ;;  %s3298_s17 = sld [smem:[#allocation19_spill]] }
 0x69c   : > { %p3300_p3 = scmp.ge.s32.totalorder %s2668_s14, 2 }
 0x6a1   : > { %s2003_s2 = sand.u32 1, %s3297_s15   ;;  %p3299_p13 = scmp.ne.s32.totalorder %s3298_s17, 0 }
 0x6a2   : > { %s2004_s20 = scalar_lea.sflag [#allocation5], %s2003_s2 }
 0x6a3   : > { %p2338_p5 = pnand %p3300_p3, %p3299_p13 }
 0x6a5   : > { %2643 = dma.done.wait (!%p2338_p5), %s2004_s20, 128  }
 0x6a6   : > { %2645 = vsyncadd (!%p2338_p5), %s2004_s20, 4294967168  ;;  %s29_s14 = sadd.s32 1, %s2668_s14   ;;  %s3301_s30 = smov %s2652_s10 }
 0x6a7   : > { %p26_p6 = scmp.ge.s32.totalorder %s29_s14, 4   ;;  %s3302_s10 = smov %s2656_s11 }
 0x6a8   : > { %s3303_s11 = smov %s2910_s29  ;;  %s3304_s12 = smov %s2664_s13 }
 0x6a9   : > { %s3305_s13 = smov %s3307_s22  ;;  %28 = sbr.rel (!%p26_p6) target bundleno = 16 (0x10), region = 133 }
 0x6b0   :  { %2009 = vsyncpa [#allocation4], 1 }
 0x6b1   :  { %2011 = vsyncpa [#allocation4 + $0x1], 1 }
 0x6b2   :  { %2012 = vsyncpa [#allocation7], 1 }
 0x6b3   :  { %2014 = vsyncpa [#allocation7 + $0x1], 1 }
 0x6b4   :  { %2015 = vsyncpa [#allocation10], 1 }
 0x6b5   :  { %2016 = vsyncpa [#allocation5], 1 }
 0x6b6   :  { %2018 = vsyncpa [#allocation5 + $0x1], 1 }

</bundles_post_ra>
